<compile_context>
chip_gen: v5e
topology: v5e:2x2
jax: 0.10.0
libtpu: 0.0.40
codegen_flags: <defaults>
</compile_context>

<pallas_src>
import jax
import jax.numpy as jnp
from jax.experimental import pallas as pl
from jax.experimental.pallas import tpu as pltpu


def _round_up(x, m):
    return ((x + m - 1) // m) * m


def actor_kernel(x_ref, w1_ref, b1_ref, w2_ref, b2_ref, wh_ref, bh_ref, out_ref):
    # fc1 + relu  (MXU matmul, f32 accumulation; elementwise stays f32)
    x = x_ref[...].astype(w1_ref.dtype)
    h1 = jnp.dot(x, w1_ref[...], preferred_element_type=jnp.float32) + b1_ref[...]
    h1 = jnp.maximum(h1, 0.0)

    # fc2 + relu
    h2 = jnp.dot(h1.astype(w2_ref.dtype), w2_ref[...],
                 preferred_element_type=jnp.float32) + b2_ref[...]
    h2 = jnp.maximum(h2, 0.0)

    # fused heads: wh = [wm | ws]  ->  head = [mean | log_std]
    head = jnp.dot(h2.astype(wh_ref.dtype), wh_ref[...],
                   preferred_element_type=jnp.float32) + bh_ref[...]

    # single fused output slab: [mean | std], std = exp(log_std).
    # Elementwise mask instead of lane slicing so tiny / unaligned head widths lower cleanly.
    half = out_ref.shape[1] // 2
    cols = jax.lax.broadcasted_iota(jnp.int32, head.shape, 1)
    is_std = cols >= half
    std = jnp.exp(jnp.where(is_std, head, 0.0))        # exp runs on the EUP slot
    out_ref[...] = jnp.where(is_std, std, head).astype(out_ref.dtype)


def pack_params(params, state_dim, hidden_dim, action_dim, *,
                compute_dtype=jnp.float32, head_dtype=None, pad_head_lanes=False):
    """Prepare kernel operands.

    * state feature dim padded only to the sublane multiple (8 f32 / 16 bf16).
    * hidden dim padded to a multiple of 128 (weights are VMEM-resident; cheap).
    * mean / log_std heads fused column-wise; head columns left unpadded by default
      (minimal writeback bytes) or 128-lane padded if pad_head_lanes=True.
    * matmul operands cast to compute_dtype (head optionally to head_dtype);
      biases stay f32 (elementwise path).
    """
    if head_dtype is None:
        head_dtype = compute_dtype
    sub = 16 if compute_dtype in (jnp.bfloat16, jnp.float16) else 8
    Sx = _round_up(state_dim, sub)
    Ph = _round_up(hidden_dim, 128)
    Pa = _round_up(action_dim, 128) if pad_head_lanes else action_dim

    def pad2(a, rows, cols):
        if a.shape == (rows, cols):
            return a
        return jnp.zeros((rows, cols), a.dtype).at[:a.shape[0], :a.shape[1]].set(a)

    w1 = pad2(params["w1"], Sx, Ph).astype(compute_dtype)
    b1 = pad2(params["b1"], 1, Ph).astype(jnp.float32)
    w2 = pad2(params["w2"], Ph, Ph).astype(compute_dtype)
    b2 = pad2(params["b2"], 1, Ph).astype(jnp.float32)
    wh = jnp.concatenate([pad2(params["wm"], Ph, Pa),
                          pad2(params["ws"], Ph, Pa)], axis=1).astype(head_dtype)
    bh = jnp.concatenate([pad2(params["bm"], 1, Pa),
                          pad2(params["bs"], 1, Pa)], axis=1).astype(jnp.float32)
    return dict(w1=w1, b1=b1, w2=w2, b2=b2, wh=wh, bh=bh,
                dims=(Sx, Ph, Pa), action_dim=action_dim)


def actor_forward(state, packed, *, batch_tile=512, vmem_limit_bytes=None,
                  interpret=False):
    """state: (B, state_dim) float32.  packed: output of pack_params.

    batch_tile: rows per grid step. 512 default (>=256 fills v6e/v7x MXU rows).
    On v5e with very large hidden dims, cap batch_tile at ~256-512 or raise
    vmem_limit_bytes explicitly.
    """
    B, state_dim = state.shape
    Sx, Ph, Pa = packed["dims"]
    action_dim = packed["action_dim"]
    head_cols = 2 * Pa
    cdt = packed["w1"].dtype

    # Feature pad of x only up to the sublane multiple (usually a no-op), then
    # wrapper-side cast so the dominant activation stream moves at the compute dtype.
    x = state
    if Sx != state_dim:
        x = jnp.zeros((B, Sx), state.dtype).at[:, :state_dim].set(state)
    x = x.astype(cdt)

    # Batch tile: multiple of 8 sublanes, capped by the batch; prefer >=2 grid
    # steps (when B allows) so both v7x TensorCores get work.
    TB = min(batch_tile, _round_up(B, 8))
    TB = max(8, _round_up(TB, 8))
    if B > 8 and pl.cdiv(B, TB) < 2:
        TB = _round_up(pl.cdiv(B, 2), 8)
    grid = (pl.cdiv(B, TB),)   # last block may be partial: reads are garbage-padded,
                               # writes are masked, so results stay correct.

    weight_keys = ("w1", "b1", "w2", "b2", "wh", "bh")
    flops = 2 * B * (Sx * Ph + Ph * Ph + Ph * head_cols)
    bytes_accessed = (x.size * x.dtype.itemsize
                      + sum(packed[k].size * packed[k].dtype.itemsize
                            for k in weight_keys)
                      + B * head_cols * 4)
    cost = pl.CostEstimate(flops=flops, transcendentals=B * Pa,
                           bytes_accessed=bytes_accessed)

    def build(use_buffered):
        def resident(shape):
            # Constant index_map -> block stays VMEM-resident across the grid.
            if use_buffered:
                return pl.BlockSpec(shape, lambda i: (0, 0),
                                    pipeline_mode=pl.Buffered(1))
            return pl.BlockSpec(shape, lambda i: (0, 0))

        return pl.pallas_call(
            actor_kernel,
            grid=grid,
            in_specs=[
                pl.BlockSpec((TB, Sx), lambda i: (i, 0)),        # state tile
                resident((Sx, Ph)), resident((1, Ph)),           # fc1
                resident((Ph, Ph)), resident((1, Ph)),           # fc2
                resident((Ph, head_cols)), resident((1, head_cols)),  # fused heads
            ],
            out_specs=pl.BlockSpec((TB, head_cols), lambda i: (i, 0)),
            out_shape=jax.ShapeDtypeStruct((B, head_cols), jnp.float32),
            compiler_params=pltpu.CompilerParams(
                dimension_semantics=("parallel",),
                vmem_limit_bytes=vmem_limit_bytes),
            cost_estimate=cost,
            interpret=interpret,
        )

    args = (x, packed["w1"], packed["b1"], packed["w2"], packed["b2"],
            packed["wh"], packed["bh"])
    try:
        out = build(True)(*args)
    except Exception:
        # pipeline_mode=pl.Buffered(1) unsupported on this jax version -> default buffering.
        out = build(False)(*args)

    mean = out[:, :action_dim]
    std = out[:, Pa:Pa + action_dim]
    return mean, std


def init_params(key, state_dim, hidden_dim, action_dim):
    """PyTorch-Linear-like init. Weights stored (in, out); biases (1, out)."""
    def linear(k, fan_in, fan_out):
        kw, kb = jax.random.split(k)
        bound = 1.0 / jnp.sqrt(fan_in)
        w = jax.random.uniform(kw, (fan_in, fan_out), jnp.float32, -bound, bound)
        b = jax.random.uniform(kb, (1, fan_out), jnp.float32, -bound, bound)
        return w, b

    k1, k2, k3, k4 = jax.random.split(key, 4)
    w1, b1 = linear(k1, state_dim, hidden_dim)
    w2, b2 = linear(k2, hidden_dim, hidden_dim)
    wm, bm = linear(k3, hidden_dim, action_dim)
    ws, bs = linear(k4, hidden_dim, action_dim)
    return dict(w1=w1, b1=b1, w2=w2, b2=b2, wm=wm, bm=bm, ws=ws, bs=bs)


def actor_forward_ref(state, p):
    h1 = jnp.maximum(state @ p["w1"] + p["b1"], 0.0)
    h2 = jnp.maximum(h1 @ p["w2"] + p["b2"], 0.0)
    mean = h2 @ p["wm"] + p["bm"]
    std = jnp.exp(h2 @ p["ws"] + p["bs"])
    return mean, std


if __name__ == "__main__":
    # Small, module-consistent shapes.
    batch, state_dim, hidden_dim, action_dim = 8, 16, 32, 4
    action_range = 1.0  # TODO(synk): action_range is stored on the module but unused in forward()

    key = jax.random.PRNGKey(0)
    k_params, k_state, k_state2 = jax.random.split(key, 3)
    params = init_params(k_params, state_dim, hidden_dim, action_dim)
    state = jax.random.normal(k_state, (batch, state_dim), jnp.float32)

    mean_ref, std_ref = actor_forward_ref(state, params)

    # --- 1) f32 operands, lane-tight fused [mean | std] output (exact check) ---
    packed_f32 = pack_params(params, state_dim, hidden_dim, action_dim,
                             compute_dtype=jnp.float32)
    mean, std = actor_forward(state, packed_f32)
    jax.block_until_ready((mean, std))
    assert mean.shape == (batch, action_dim) and std.shape == (batch, action_dim)
    assert jnp.allclose(mean, mean_ref, atol=1e-5, rtol=1e-5)
    assert jnp.allclose(std, std_ref, atol=1e-5, rtol=1e-5)
    assert bool(jnp.all(std > 0))

    # --- 2) multi-step grid with a partial (masked) last batch block,
    #        128-lane-padded head output variant ---
    batch2 = 20
    state2 = jax.random.normal(k_state2, (batch2, state_dim), jnp.float32)
    mean2_ref, std2_ref = actor_forward_ref(state2, params)
    packed_pad = pack_params(params, state_dim, hidden_dim, action_dim,
                             compute_dtype=jnp.float32, pad_head_lanes=True)
    mean2, std2 = actor_forward(state2, packed_pad, batch_tile=8)
    jax.block_until_ready((mean2, std2))
    assert mean2.shape == (batch2, action_dim)
    assert jnp.allclose(mean2, mean2_ref, atol=1e-5, rtol=1e-5)
    assert jnp.allclose(std2, std2_ref, atol=1e-5, rtol=1e-5)

    # --- 3) bf16 matmul operands for fc1/fc2 (native MXU dtype on v6e/v7x),
    #        f32 head operands for tighter std accuracy, f32 accumulation ---
    packed_bf16 = pack_params(params, state_dim, hidden_dim, action_dim,
                              compute_dtype=jnp.bfloat16, head_dtype=jnp.float32)
    mean_b, std_b = actor_forward(state, packed_bf16)
    jax.block_until_ready((mean_b, std_b))
    assert jnp.allclose(mean_b, mean_ref, atol=5e-2, rtol=5e-2)
    assert jnp.allclose(std_b, std_ref, atol=5e-2, rtol=5e-2)
    assert bool(jnp.all(std_b > 0))

    print("KERNEL_OK")
</pallas_src>

<mosaic_0001>
module attributes {stable_mosaic.version = 11 : i64} {
  func.func @actor_kernel(%arg0: i32, %arg1: memref<8x16xf32, #tpu.memory_space<vmem>>, %arg2: memref<16x128xf32, #tpu.memory_space<vmem>>, %arg3: memref<1x128xf32, #tpu.memory_space<vmem>>, %arg4: memref<128x128xf32, #tpu.memory_space<vmem>>, %arg5: memref<1x128xf32, #tpu.memory_space<vmem>>, %arg6: memref<128x8xf32, #tpu.memory_space<vmem>>, %arg7: memref<1x8xf32, #tpu.memory_space<vmem>>, %arg8: memref<8x8xf32, #tpu.memory_space<vmem>>) attributes {dimension_semantics = [#tpu.dimension_semantics<parallel>], iteration_bounds = array<i64: 1>, scalar_prefetch = 0 : i64, scratch_operands = 0 : i64, tpu.core_type = #tpu.core_type<tc>, window_params = [{transform_indices = @transform_0, window_bounds = array<i64: 8, 16>}, {pipeline_mode = #tpu.pipeline_mode<synchronous>, transform_indices = @transform_1, window_bounds = array<i64: 16, 128>}, {pipeline_mode = #tpu.pipeline_mode<synchronous>, transform_indices = @transform_2, window_bounds = array<i64: 1, 128>}, {pipeline_mode = #tpu.pipeline_mode<synchronous>, transform_indices = @transform_3, window_bounds = array<i64: 128, 128>}, {pipeline_mode = #tpu.pipeline_mode<synchronous>, transform_indices = @transform_4, window_bounds = array<i64: 1, 128>}, {pipeline_mode = #tpu.pipeline_mode<synchronous>, transform_indices = @transform_5, window_bounds = array<i64: 128, 8>}, {pipeline_mode = #tpu.pipeline_mode<synchronous>, transform_indices = @transform_6, window_bounds = array<i64: 1, 8>}, {transform_indices = @transform_7, window_bounds = array<i64: 8, 8>}]} {
    %c0 = arith.constant 0 : index
    %c0_0 = arith.constant 0 : index
    %0 = vector.load %arg1[%c0, %c0_0] : memref<8x16xf32, #tpu.memory_space<vmem>>, vector<8x16xf32>
    %c0_1 = arith.constant 0 : index
    %c0_2 = arith.constant 0 : index
    %1 = vector.load %arg2[%c0_1, %c0_2] : memref<16x128xf32, #tpu.memory_space<vmem>>, vector<16x128xf32>
    %cst = arith.constant dense<0.000000e+00> : vector<8x128xf32>
    %2 = tpu.matmul %0, %1, %cst {dimension_numbers = #tpu.dot_dimension_numbers<[1], [0], [0], [1], [0, 0, 1, 1], [], []>} : vector<8x16xf32>, vector<16x128xf32>, vector<8x128xf32> -> vector<8x128xf32>
    %c0_3 = arith.constant 0 : index
    %c0_4 = arith.constant 0 : index
    %3 = vector.load %arg3[%c0_3, %c0_4] : memref<1x128xf32, #tpu.memory_space<vmem>>, vector<1x128xf32>
    %4 = vector.broadcast %3 : vector<1x128xf32> to vector<8x128xf32>
    %5 = arith.addf %2, %4 : vector<8x128xf32>
    %cst_5 = arith.constant 0.000000e+00 : f32
    %6 = vector.broadcast %cst_5 : f32 to vector<8x128xf32>
    %7 = arith.maximumf %5, %6 : vector<8x128xf32>
    %c0_6 = arith.constant 0 : index
    %c0_7 = arith.constant 0 : index
    %8 = vector.load %arg4[%c0_6, %c0_7] : memref<128x128xf32, #tpu.memory_space<vmem>>, vector<128x128xf32>
    %cst_8 = arith.constant dense<0.000000e+00> : vector<8x128xf32>
    %9 = tpu.matmul %7, %8, %cst_8 {dimension_numbers = #tpu.dot_dimension_numbers<[1], [0], [0], [1], [0, 0, 1, 1], [], []>} : vector<8x128xf32>, vector<128x128xf32>, vector<8x128xf32> -> vector<8x128xf32>
    %c0_9 = arith.constant 0 : index
    %c0_10 = arith.constant 0 : index
    %10 = vector.load %arg5[%c0_9, %c0_10] : memref<1x128xf32, #tpu.memory_space<vmem>>, vector<1x128xf32>
    %11 = vector.broadcast %10 : vector<1x128xf32> to vector<8x128xf32>
    %12 = arith.addf %9, %11 : vector<8x128xf32>
    %cst_11 = arith.constant 0.000000e+00 : f32
    %13 = vector.broadcast %cst_11 : f32 to vector<8x128xf32>
    %14 = arith.maximumf %12, %13 : vector<8x128xf32>
    %c0_12 = arith.constant 0 : index
    %c0_13 = arith.constant 0 : index
    %15 = vector.load %arg6[%c0_12, %c0_13] : memref<128x8xf32, #tpu.memory_space<vmem>>, vector<128x8xf32>
    %cst_14 = arith.constant dense<0.000000e+00> : vector<8x8xf32>
    %16 = tpu.matmul %14, %15, %cst_14 {dimension_numbers = #tpu.dot_dimension_numbers<[1], [0], [0], [1], [0, 0, 1, 1], [], []>} : vector<8x128xf32>, vector<128x8xf32>, vector<8x8xf32> -> vector<8x8xf32>
    %c0_15 = arith.constant 0 : index
    %c0_16 = arith.constant 0 : index
    %17 = vector.load %arg7[%c0_15, %c0_16] : memref<1x8xf32, #tpu.memory_space<vmem>>, vector<1x8xf32>
    %18 = vector.broadcast %17 : vector<1x8xf32> to vector<8x8xf32>
    %19 = arith.addf %16, %18 : vector<8x8xf32>
    %20 = tpu.iota {dimensions = array<i32: 1>} : vector<8x8xi32>
    %c4_i32 = arith.constant 4 : i32
    %21 = vector.broadcast %c4_i32 : i32 to vector<8x8xi32>
    %22 = arith.cmpi sge, %20, %21 : vector<8x8xi32>
    %cst_17 = arith.constant 0.000000e+00 : f32
    %23 = vector.broadcast %cst_17 : f32 to vector<8x8xf32>
    %24 = arith.select %22, %19, %23 : vector<8x8xi1>, vector<8x8xf32>
    %25 = math.exp %24 : vector<8x8xf32>
    %26 = arith.select %22, %25, %19 : vector<8x8xi1>, vector<8x8xf32>
    %c0_18 = arith.constant 0 : index
    %c0_19 = arith.constant 0 : index
    %27 = vector.load %arg8[%c0_18, %c0_19] : memref<8x8xf32, #tpu.memory_space<vmem>>, vector<8x8xf32>
    tpu.vector_store %arg8[%c0_18, %c0_19], %26 {strides = array<i32>} : memref<8x8xf32, #tpu.memory_space<vmem>>, vector<8x8xf32>,
    return
  }
  func.func @transform_0(%arg0: i32) -> (i32, i32) {
    %c0_i32 = arith.constant 0 : i32
    %c0_i32_0 = arith.constant 0 : i32
    return %arg0, %c0_i32 : i32, i32
  }
  func.func @transform_1(%arg0: i32) -> (i32, i32) {
    %c0_i32 = arith.constant 0 : i32
    %c0_i32_0 = arith.constant 0 : i32
    %c0_i32_1 = arith.constant 0 : i32
    return %c0_i32, %c0_i32_0 : i32, i32
  }
  func.func @transform_2(%arg0: i32) -> (i32, i32) {
    %c0_i32 = arith.constant 0 : i32
    %c0_i32_0 = arith.constant 0 : i32
    %c0_i32_1 = arith.constant 0 : i32
    return %c0_i32, %c0_i32_0 : i32, i32
  }
  func.func @transform_3(%arg0: i32) -> (i32, i32) {
    %c0_i32 = arith.constant 0 : i32
    %c0_i32_0 = arith.constant 0 : i32
    %c0_i32_1 = arith.constant 0 : i32
    return %c0_i32, %c0_i32_0 : i32, i32
  }
  func.func @transform_4(%arg0: i32) -> (i32, i32) {
    %c0_i32 = arith.constant 0 : i32
    %c0_i32_0 = arith.constant 0 : i32
    %c0_i32_1 = arith.constant 0 : i32
    return %c0_i32, %c0_i32_0 : i32, i32
  }
  func.func @transform_5(%arg0: i32) -> (i32, i32) {
    %c0_i32 = arith.constant 0 : i32
    %c0_i32_0 = arith.constant 0 : i32
    %c0_i32_1 = arith.constant 0 : i32
    return %c0_i32, %c0_i32_0 : i32, i32
  }
  func.func @transform_6(%arg0: i32) -> (i32, i32) {
    %c0_i32 = arith.constant 0 : i32
    %c0_i32_0 = arith.constant 0 : i32
    %c0_i32_1 = arith.constant 0 : i32
    return %c0_i32, %c0_i32_0 : i32, i32
  }
  func.func @transform_7(%arg0: i32) -> (i32, i32) {
    %c0_i32 = arith.constant 0 : i32
    %c0_i32_0 = arith.constant 0 : i32
    return %arg0, %c0_i32 : i32, i32
  }
}

module attributes {stable_mosaic.version = 11 : i64} {
  func.func @actor_kernel(%arg0: i32, %arg1: memref<8x16xf32, #tpu.memory_space<vmem>>, %arg2: memref<16x128xf32, #tpu.memory_space<vmem>>, %arg3: memref<1x128xf32, #tpu.memory_space<vmem>>, %arg4: memref<128x128xf32, #tpu.memory_space<vmem>>, %arg5: memref<1x128xf32, #tpu.memory_space<vmem>>, %arg6: memref<128x8xf32, #tpu.memory_space<vmem>>, %arg7: memref<1x8xf32, #tpu.memory_space<vmem>>, %arg8: memref<8x8xf32, #tpu.memory_space<vmem>>) attributes {dimension_semantics = [#tpu.dimension_semantics<parallel>], iteration_bounds = array<i64: 1>, scalar_prefetch = 0 : i64, scratch_operands = 0 : i64, tpu.core_type = #tpu.core_type<tc>, window_params = [{transform_indices = @transform_0, window_bounds = array<i64: 8, 16>}, {pipeline_mode = #tpu.pipeline_mode<synchronous>, transform_indices = @transform_1, window_bounds = array<i64: 16, 128>}, {pipeline_mode = #tpu.pipeline_mode<synchronous>, transform_indices = @transform_2, window_bounds = array<i64: 1, 128>}, {pipeline_mode = #tpu.pipeline_mode<synchronous>, transform_indices = @transform_3, window_bounds = array<i64: 128, 128>}, {pipeline_mode = #tpu.pipeline_mode<synchronous>, transform_indices = @transform_4, window_bounds = array<i64: 1, 128>}, {pipeline_mode = #tpu.pipeline_mode<synchronous>, transform_indices = @transform_5, window_bounds = array<i64: 128, 8>}, {pipeline_mode = #tpu.pipeline_mode<synchronous>, transform_indices = @transform_6, window_bounds = array<i64: 1, 8>}, {transform_indices = @transform_7, window_bounds = array<i64: 8, 8>}]} {
    %c0 = arith.constant 0 : index
    %c0_0 = arith.constant 0 : index
    %0 = vector.load %arg1[%c0, %c0_0] : memref<8x16xf32, #tpu.memory_space<vmem>>, vector<8x16xf32>
    %c0_1 = arith.constant 0 : index
    %c0_2 = arith.constant 0 : index
    %1 = vector.load %arg2[%c0_1, %c0_2] : memref<16x128xf32, #tpu.memory_space<vmem>>, vector<16x128xf32>
    %cst = arith.constant dense<0.000000e+00> : vector<8x128xf32>
    %2 = tpu.matmul %0, %1, %cst {dimension_numbers = #tpu.dot_dimension_numbers<[1], [0], [0], [1], [0, 0, 1, 1], [], []>} : vector<8x16xf32>, vector<16x128xf32>, vector<8x128xf32> -> vector<8x128xf32>
    %c0_3 = arith.constant 0 : index
    %c0_4 = arith.constant 0 : index
    %3 = vector.load %arg3[%c0_3, %c0_4] : memref<1x128xf32, #tpu.memory_space<vmem>>, vector<1x128xf32>
    %4 = vector.broadcast %3 : vector<1x128xf32> to vector<8x128xf32>
    %5 = arith.addf %2, %4 : vector<8x128xf32>
    %cst_5 = arith.constant 0.000000e+00 : f32
    %6 = vector.broadcast %cst_5 : f32 to vector<8x128xf32>
    %7 = arith.maximumf %5, %6 : vector<8x128xf32>
    %c0_6 = arith.constant 0 : index
    %c0_7 = arith.constant 0 : index
    %8 = vector.load %arg4[%c0_6, %c0_7] : memref<128x128xf32, #tpu.memory_space<vmem>>, vector<128x128xf32>
    %cst_8 = arith.constant dense<0.000000e+00> : vector<8x128xf32>
    %9 = tpu.matmul %7, %8, %cst_8 {dimension_numbers = #tpu.dot_dimension_numbers<[1], [0], [0], [1], [0, 0, 1, 1], [], []>} : vector<8x128xf32>, vector<128x128xf32>, vector<8x128xf32> -> vector<8x128xf32>
    %c0_9 = arith.constant 0 : index
    %c0_10 = arith.constant 0 : index
    %10 = vector.load %arg5[%c0_9, %c0_10] : memref<1x128xf32, #tpu.memory_space<vmem>>, vector<1x128xf32>
    %11 = vector.broadcast %10 : vector<1x128xf32> to vector<8x128xf32>
    %12 = arith.addf %9, %11 : vector<8x128xf32>
    %cst_11 = arith.constant 0.000000e+00 : f32
    %13 = vector.broadcast %cst_11 : f32 to vector<8x128xf32>
    %14 = arith.maximumf %12, %13 : vector<8x128xf32>
    %c0_12 = arith.constant 0 : index
    %c0_13 = arith.constant 0 : index
    %15 = vector.load %arg6[%c0_12, %c0_13] : memref<128x8xf32, #tpu.memory_space<vmem>>, vector<128x8xf32>
    %cst_14 = arith.constant dense<0.000000e+00> : vector<8x8xf32>
    %16 = tpu.matmul %14, %15, %cst_14 {dimension_numbers = #tpu.dot_dimension_numbers<[1], [0], [0], [1], [0, 0, 1, 1], [], []>} : vector<8x128xf32>, vector<128x8xf32>, vector<8x8xf32> -> vector<8x8xf32>
    %c0_15 = arith.constant 0 : index
    %c0_16 = arith.constant 0 : index
    %17 = vector.load %arg7[%c0_15, %c0_16] : memref<1x8xf32, #tpu.memory_space<vmem>>, vector<1x8xf32>
    %18 = vector.broadcast %17 : vector<1x8xf32> to vector<8x8xf32>
    %19 = arith.addf %16, %18 : vector<8x8xf32>
    %20 = tpu.iota {dimensions = array<i32: 1>} : vector<8x8xi32>
    %c4_i32 = arith.constant 4 : i32
    %21 = vector.broadcast %c4_i32 : i32 to vector<8x8xi32>
    %22 = arith.cmpi sge, %20, %21 : vector<8x8xi32>
    %cst_17 = arith.constant 0.000000e+00 : f32
    %23 = vector.broadcast %cst_17 : f32 to vector<8x8xf32>
    %24 = arith.select %22, %19, %23 : vector<8x8xi1>, vector<8x8xf32>
    %25 = math.exp %24 : vector<8x8xf32>
    %26 = arith.select %22, %25, %19 : vector<8x8xi1>, vector<8x8xf32>
    %c0_18 = arith.constant 0 : index
    %c0_19 = arith.constant 0 : index
    %27 = vector.load %arg8[%c0_18, %c0_19] : memref<8x8xf32, #tpu.memory_space<vmem>>, vector<8x8xf32>
    tpu.vector_store %arg8[%c0_18, %c0_19], %26 {strides = array<i32>} : memref<8x8xf32, #tpu.memory_space<vmem>>, vector<8x8xf32>,
    return
  }
  func.func @transform_0(%arg0: i32) -> (i32, i32) {
    %c0_i32 = arith.constant 0 : i32
    %c0_i32_0 = arith.constant 0 : i32
    return %arg0, %c0_i32 : i32, i32
  }
  func.func @transform_1(%arg0: i32) -> (i32, i32) {
    %c0_i32 = arith.constant 0 : i32
    %c0_i32_0 = arith.constant 0 : i32
    %c0_i32_1 = arith.constant 0 : i32
    return %c0_i32, %c0_i32_0 : i32, i32
  }
  func.func @transform_2(%arg0: i32) -> (i32, i32) {
    %c0_i32 = arith.constant 0 : i32
    %c0_i32_0 = arith.constant 0 : i32
    %c0_i32_1 = arith.constant 0 : i32
    return %c0_i32, %c0_i32_0 : i32, i32
  }
  func.func @transform_3(%arg0: i32) -> (i32, i32) {
    %c0_i32 = arith.constant 0 : i32
    %c0_i32_0 = arith.constant 0 : i32
    %c0_i32_1 = arith.constant 0 : i32
    return %c0_i32, %c0_i32_0 : i32, i32
  }
  func.func @transform_4(%arg0: i32) -> (i32, i32) {
    %c0_i32 = arith.constant 0 : i32
    %c0_i32_0 = arith.constant 0 : i32
    %c0_i32_1 = arith.constant 0 : i32
    return %c0_i32, %c0_i32_0 : i32, i32
  }
  func.func @transform_5(%arg0: i32) -> (i32, i32) {
    %c0_i32 = arith.constant 0 : i32
    %c0_i32_0 = arith.constant 0 : i32
    %c0_i32_1 = arith.constant 0 : i32
    return %c0_i32, %c0_i32_0 : i32, i32
  }
  func.func @transform_6(%arg0: i32) -> (i32, i32) {
    %c0_i32 = arith.constant 0 : i32
    %c0_i32_0 = arith.constant 0 : i32
    %c0_i32_1 = arith.constant 0 : i32
    return %c0_i32, %c0_i32_0 : i32, i32
  }
  func.func @transform_7(%arg0: i32) -> (i32, i32) {
    %c0_i32 = arith.constant 0 : i32
    %c0_i32_0 = arith.constant 0 : i32
    return %arg0, %c0_i32 : i32, i32
  }
}

</mosaic_0001>

<bundles_post_ra>
// kernel: tpu_custom_call.1
= control target key start
LH: loop header
LB: loop body
LE: loop exit
PB: predicated region body
PF: predicated region fallthrough
CT: control target
= control target key end

     0   :  { %12 = vsyncpa [#allocation3], 0  ;;  %s402_s0 = inlined_call_operand.vmem [shape: f32[8,16], index: 0, kind: input, shape index: {}]   ;;  %s403_s1 = inlined_call_operand.hbm [shape: f32[16,128], index: 1, kind: input, shape index: {}]   ;;  %s404_s2 = inlined_call_operand.vmem [shape: f32[1,128], index: 2, kind: input, shape index: {}]   ;;  %s405_s3 = inlined_call_operand.vmem [shape: f32[128,128], index: 3, kind: input, shape index: {}]   ;;  %s406_s4 = inlined_call_operand.vmem [shape: f32[1,128], index: 4, kind: input, shape index: {}]   ;;  %s407_s5 = inlined_call_operand.vmem [shape: f32[128,8], index: 5, kind: input, shape index: {}]   ;;  %s408_s6 = inlined_call_operand.vmem [shape: f32[1,8], index: 6, kind: input, shape index: {}]   ;;  %s409_s7 = inlined_call_operand.hbm [shape: f32[8,8], index: 7, kind: output, shape index: {}]  }
   0x1   :  { %13 = vsyncpa [#allocation4], 0  ;;  %s20_s26 = sshll.u32 %s403_s1, 4  ;;  %s244_s27 = smov [#allocation2]   ;;  %s21_s26 = int_to_ptr.hbm [resolvable:$true] %s20_s26 }
   0x2   :  { %s22_s28 = sshll.u32 %s244_s27, 4  ;;  %s245_s29 = smov 128   ;;  %s23_s28 = int_to_ptr.vmem [resolvable:$true] %s22_s28 }
   0x3   :  { %s246_s30 = smov 8  }
   0x4   :  { %28 = dma.hbm_to_vmem [thread:$0]  %s21_s26, 256, %s23_s28, [#allocation3], %s245_s29, %s245_s29, %s246_s30  }
   0x5   :  { %240 = dma.done.wait [#allocation3], 256  }
   0x6   :  { %241 = vsyncadd [#allocation3], 4294967040  ;;  %v45_v0 = vld [vmem:[#allocation2 + $0x8] sm:$0xff]  ;;  %v44_v1 = vld [vmem:[#allocation2] sm:$0xff]  ;;  %vm50_vm0 = vcmask 130048   ;;  %v156_v43 = vlaneseq  ;;  %s172_s27 = sshll.u32 %s409_s7, 4  ;;  %s173_s27 = int_to_ptr.hbm [resolvable:$true] %s172_s27 }
   0x7   :  { %68 = vmatpush.msra.mxu0 %v45_v0  ;;  %v43_v2 = vld [vmem:[%s402_s0] sm:$0xff]  ;;  %v90_v3 = vld [vmem:[%s405_s3 + $0x78] sm:$0xff]  ;;  %v89_v4 = vld [vmem:[%s405_s3 + $0x70] sm:$0xff]  ;;  %vm163_vm2 = vcmask 64512  }
   0x8   :  { %95 = vmatpush.msra.mxu1 %v90_v3  ;;  %v88_v5 = vld [vmem:[%s405_s3 + $0x68] sm:$0xff]  ;;  %v87_v6 = vld [vmem:[%s405_s3 + $0x60] sm:$0xff]  ;;  %v86_v7 = vld [vmem:[%s405_s3 + $0x58] sm:$0xff]  ;;  %v157_v44 = vand.u32 127, %v156_v43 }
   0x9   :  { %69 = vmatpush.msra.mxu0 %v44_v1  ;;  %v85_v8 = vld [vmem:[%s405_s3 + $0x50] sm:$0xff]  ;;  %v84_v9 = vld [vmem:[%s405_s3 + $0x48] sm:$0xff]  ;;  %v83_v10 = vld [vmem:[%s405_s3 + $0x40] sm:$0xff] }
   0xa   :  { %182 = vmatmul.msk.f32.vlgmr.msra.gmra.mxu0 %vm50_vm0, %v43_v2  ;;  %96 = vmatpush.msra.mxu1 %v89_v4  ;;  %v82_v11 = vld [vmem:[%s405_s3 + $0x38] sm:$0xff]  ;;  %v81_v12 = vld [vmem:[%s405_s3 + $0x30] sm:$0xff]  ;;  %v80_v13 = vld [vmem:[%s405_s3 + $0x28] sm:$0xff]  ;;  %vm158_vm1 = vcmp.ge.s32.totalorder %v157_v44, 4 }
   0xb   :  { %v79_v14 = vld [vmem:[%s405_s3 + $0x20] sm:$0xff]  ;;  %v78_v15 = vld [vmem:[%s405_s3 + $0x18] sm:$0xff]  ;;  %v77_v16 = vld [vmem:[%s405_s3 + $0x10] sm:$0xff] }
   0xc   :  { %97 = vmatpush.msra.mxu1 %v88_v5  ;;  %v76_v17 = vld [vmem:[%s405_s3 + $0x8] sm:$0xff]  ;;  %v75_v18 = vld [vmem:[%s405_s3] sm:$0xff]  ;;  %v131_v19 = vld [vmem:[%s407_s5 + $0x78] sm:$0xff] }
   0xd   :  { %v130_v20 = vld [vmem:[%s407_s5 + $0x70] sm:$0xff]  ;;  %136 = vmatpush.msra.mxu2 %v131_v19  ;;  %v129_v21 = vld [vmem:[%s407_s5 + $0x68] sm:$0xff]  ;;  %v128_v22 = vld [vmem:[%s407_s5 + $0x60] sm:$0xff] }
   0xe   :  { %98 = vmatpush.msra.mxu1 %v87_v6  ;;  %v127_v23 = vld [vmem:[%s407_s5 + $0x58] sm:$0xff]  ;;  %v126_v24 = vld [vmem:[%s407_s5 + $0x50] sm:$0xff]  ;;  %v125_v25 = vld [vmem:[%s407_s5 + $0x48] sm:$0xff] }
   0xf   :  { %137 = vmatpush.msra.mxu2 %v130_v20  ;;  %v124_v26 = vld [vmem:[%s407_s5 + $0x40] sm:$0xff]  ;;  %v123_v27 = vld [vmem:[%s407_s5 + $0x38] sm:$0xff]  ;;  %v122_v28 = vld [vmem:[%s407_s5 + $0x30] sm:$0xff] }
  0x10   :  { %99 = vmatpush.msra.mxu1 %v86_v7  ;;  %v121_v29 = vld [vmem:[%s407_s5 + $0x28] sm:$0xff]  ;;  %v120_v30 = vld [vmem:[%s407_s5 + $0x20] sm:$0xff]  ;;  %v119_v31 = vld [vmem:[%s407_s5 + $0x18] sm:$0xff] }
  0x11   :  { %138 = vmatpush.msra.mxu2 %v129_v21  ;;  %v187_v32 = vld [vmem:[%s404_s2] ss:$0 sm:$0xff]  ;;  %v118_v36 = vld [vmem:[%s407_s5 + $0x10] sm:$0xff]  ;;  %v117_v37 = vld [vmem:[%s407_s5 + $0x8] sm:$0xff] }
  0x12   :  { %100 = vmatpush.msra.mxu1 %v85_v8  ;;  %v116_v38 = vld [vmem:[%s407_s5] sm:$0xff]  ;;  %s247_s5 = smov [#allocation5]  }
  0x13   :  { %139 = vmatpush.msra.mxu2 %v128_v22  ;;  %v188_v39 = vld [vmem:[%s406_s4] ss:$0 sm:$0xff]  ;;  %s170_s25 = sshll.u32 %s247_s5, 4  ;;  %s171_s25 = int_to_ptr.vmem [resolvable:$true] %s170_s25 }
  0x14   :  { %101 = vmatpush.msra.mxu1 %v84_v9  ;;  %v189_v45 = vld [vmem:[%s408_s6] ss:$0 sm:$0xff] }
  0x15   :  { %140 = vmatpush.msra.mxu2 %v127_v23 }
  0x16   :  { %102 = vmatpush.msra.mxu1 %v83_v10 }
  0x17   :  { %141 = vmatpush.msra.mxu2 %v126_v24 }
  0x18   :  { %103 = vmatpush.msra.mxu1 %v82_v11 }
  0x19   :  { %142 = vmatpush.msra.mxu2 %v125_v25 }
  0x1a   :  { %104 = vmatpush.msra.mxu1 %v81_v12 }
  0x1b   :  { %143 = vmatpush.msra.mxu2 %v124_v26 }
  0x1c   :  { %105 = vmatpush.msra.mxu1 %v80_v13 }
  0x1d   :  { %144 = vmatpush.msra.mxu2 %v123_v27 }
  0x1e   :  { %106 = vmatpush.msra.mxu1 %v79_v14 }
  0x1f   :  { %145 = vmatpush.msra.mxu2 %v122_v28 }
  0x20   :  { %107 = vmatpush.msra.mxu1 %v78_v15 }
  0x21   :  { %146 = vmatpush.msra.mxu2 %v121_v29 }
  0x22   :  { %108 = vmatpush.msra.mxu1 %v77_v16 }
  0x23   :  { %147 = vmatpush.msra.mxu2 %v120_v30 }
  0x24   :  { %109 = vmatpush.msra.mxu1 %v76_v17 }
  0x25   :  { %148 = vmatpush.msra.mxu2 %v119_v31 }
  0x26   :  { %110 = vmatpush.msra.mxu1 %v75_v18 }
  0x27   :  { %149 = vmatpush.msra.mxu2 %v118_v36 }
  0x29   :  { %150 = vmatpush.msra.mxu2 %v117_v37 }
  0x2b   :  { %151 = vmatpush.msra.mxu2 %v116_v38 }
  0x87   :  { %v71_v33 = vpop.f32.mrf.mxu0 }
  0x88   :  { %v72_v34 = vadd.f32 %v187_v32, %v71_v33 }
  0x8a   :  { %v74_v35 = vmax.f32 %v72_v34, 0.0 }
  0x8c   :  { %111 = vmatmul.f32.vlgmr.msra.gmra.mxu1 %v74_v35 }
 0x109   :  { %v112_v40 = vpop.f32.mrf.mxu1 }
 0x10a   :  { %v113_v41 = vadd.f32 %v188_v39, %v112_v40 }
 0x10c   :  { %v115_v42 = vmax.f32 %v113_v41, 0.0 }
 0x10e   :  { %152 = vmatmul.f32.vlgmr.msra.gmra.mxu2 %v115_v42 }
 0x191   :  { %v153_v46 = vpop.f32.mrf.mxu2 }
 0x192   :  { %v154_v47 = vadd.f32 %v189_v45, %v153_v46 }
 0x194   :  { %v159_v48 = vsel %vm158_vm1, %v154_v47, 0.0 }
 0x195   :  { %v160_v49 = vmul.f32 1.442695, %v159_v48 }
 0x197   :  { %190 = vpow2.f32 %v160_v49 }
 0x19d   :  { %v191_v50 = vpop.eup %190 }
 0x19e   :  { %v162_v51 = vsel %vm158_vm1, %v191_v50, %v154_v47 }
 0x19f   :  { %164 = vst.msk [vmem:[#allocation5] sm:$0xff] %vm163_vm2, %v162_v51 }
 0x1a0   :  { %175 = dma.vmem_to_hbm [thread:$0]  %s171_s25, 128, %s173_s27, [#allocation4]  }
 0x1a1   :  { %242 = dma.done.wait [#allocation4], 128  }
 0x1a2   :  { %243 = vsyncadd [#allocation4], 4294967168 }
 0x1a3   :  { %180 = vsyncpa [#allocation3], 1 }
 0x1a4   :  { %181 = vsyncpa [#allocation4], 1 }

// kernel: tpu_custom_call.1
= control target key start
LH: loop header
LB: loop body
LE: loop exit
PB: predicated region body
PF: predicated region fallthrough
CT: control target
= control target key end

     0   :  { %12 = vsyncpa [#allocation3], 0  ;;  %s402_s0 = inlined_call_operand.vmem [shape: f32[8,16], index: 0, kind: input, shape index: {}]   ;;  %s403_s1 = inlined_call_operand.hbm [shape: f32[16,128], index: 1, kind: input, shape index: {}]   ;;  %s404_s2 = inlined_call_operand.vmem [shape: f32[1,128], index: 2, kind: input, shape index: {}]   ;;  %s405_s3 = inlined_call_operand.vmem [shape: f32[128,128], index: 3, kind: input, shape index: {}]   ;;  %s406_s4 = inlined_call_operand.vmem [shape: f32[1,128], index: 4, kind: input, shape index: {}]   ;;  %s407_s5 = inlined_call_operand.vmem [shape: f32[128,8], index: 5, kind: input, shape index: {}]   ;;  %s408_s6 = inlined_call_operand.vmem [shape: f32[1,8], index: 6, kind: input, shape index: {}]   ;;  %s409_s7 = inlined_call_operand.hbm [shape: f32[8,8], index: 7, kind: output, shape index: {}]  }
   0x1   :  { %13 = vsyncpa [#allocation4], 0  ;;  %s20_s26 = sshll.u32 %s403_s1, 4  ;;  %s244_s27 = smov [#allocation2]   ;;  %s21_s26 = int_to_ptr.hbm [resolvable:$true] %s20_s26 }
   0x2   :  { %s22_s28 = sshll.u32 %s244_s27, 4  ;;  %s245_s29 = smov 128   ;;  %s23_s28 = int_to_ptr.vmem [resolvable:$true] %s22_s28 }
   0x3   :  { %s246_s30 = smov 8  }
   0x4   :  { %28 = dma.hbm_to_vmem [thread:$0]  %s21_s26, 256, %s23_s28, [#allocation3], %s245_s29, %s245_s29, %s246_s30  }
   0x5   :  { %240 = dma.done.wait [#allocation3], 256  }
   0x6   :  { %241 = vsyncadd [#allocation3], 4294967040  ;;  %v45_v0 = vld [vmem:[#allocation2 + $0x8] sm:$0xff]  ;;  %v44_v1 = vld [vmem:[#allocation2] sm:$0xff]  ;;  %vm50_vm0 = vcmask 130048   ;;  %v156_v43 = vlaneseq  ;;  %s172_s27 = sshll.u32 %s409_s7, 4  ;;  %s173_s27 = int_to_ptr.hbm [resolvable:$true] %s172_s27 }
   0x7   :  { %68 = vmatpush.msra.mxu0 %v45_v0  ;;  %v43_v2 = vld [vmem:[%s402_s0] sm:$0xff]  ;;  %v90_v3 = vld [vmem:[%s405_s3 + $0x78] sm:$0xff]  ;;  %v89_v4 = vld [vmem:[%s405_s3 + $0x70] sm:$0xff]  ;;  %vm163_vm2 = vcmask 64512  }
   0x8   :  { %95 = vmatpush.msra.mxu1 %v90_v3  ;;  %v88_v5 = vld [vmem:[%s405_s3 + $0x68] sm:$0xff]  ;;  %v87_v6 = vld [vmem:[%s405_s3 + $0x60] sm:$0xff]  ;;  %v86_v7 = vld [vmem:[%s405_s3 + $0x58] sm:$0xff]  ;;  %v157_v44 = vand.u32 127, %v156_v43 }
   0x9   :  { %69 = vmatpush.msra.mxu0 %v44_v1  ;;  %v85_v8 = vld [vmem:[%s405_s3 + $0x50] sm:$0xff]  ;;  %v84_v9 = vld [vmem:[%s405_s3 + $0x48] sm:$0xff]  ;;  %v83_v10 = vld [vmem:[%s405_s3 + $0x40] sm:$0xff] }
   0xa   :  { %182 = vmatmul.msk.f32.vlgmr.msra.gmra.mxu0 %vm50_vm0, %v43_v2  ;;  %96 = vmatpush.msra.mxu1 %v89_v4  ;;  %v82_v11 = vld [vmem:[%s405_s3 + $0x38] sm:$0xff]  ;;  %v81_v12 = vld [vmem:[%s405_s3 + $0x30] sm:$0xff]  ;;  %v80_v13 = vld [vmem:[%s405_s3 + $0x28] sm:$0xff]  ;;  %vm158_vm1 = vcmp.ge.s32.totalorder %v157_v44, 4 }
   0xb   :  { %v79_v14 = vld [vmem:[%s405_s3 + $0x20] sm:$0xff]  ;;  %v78_v15 = vld [vmem:[%s405_s3 + $0x18] sm:$0xff]  ;;  %v77_v16 = vld [vmem:[%s405_s3 + $0x10] sm:$0xff] }
   0xc   :  { %97 = vmatpush.msra.mxu1 %v88_v5  ;;  %v76_v17 = vld [vmem:[%s405_s3 + $0x8] sm:$0xff]  ;;  %v75_v18 = vld [vmem:[%s405_s3] sm:$0xff]  ;;  %v131_v19 = vld [vmem:[%s407_s5 + $0x78] sm:$0xff] }
   0xd   :  { %v130_v20 = vld [vmem:[%s407_s5 + $0x70] sm:$0xff]  ;;  %136 = vmatpush.msra.mxu2 %v131_v19  ;;  %v129_v21 = vld [vmem:[%s407_s5 + $0x68] sm:$0xff]  ;;  %v128_v22 = vld [vmem:[%s407_s5 + $0x60] sm:$0xff] }
   0xe   :  { %98 = vmatpush.msra.mxu1 %v87_v6  ;;  %v127_v23 = vld [vmem:[%s407_s5 + $0x58] sm:$0xff]  ;;  %v126_v24 = vld [vmem:[%s407_s5 + $0x50] sm:$0xff]  ;;  %v125_v25 = vld [vmem:[%s407_s5 + $0x48] sm:$0xff] }
   0xf   :  { %137 = vmatpush.msra.mxu2 %v130_v20  ;;  %v124_v26 = vld [vmem:[%s407_s5 + $0x40] sm:$0xff]  ;;  %v123_v27 = vld [vmem:[%s407_s5 + $0x38] sm:$0xff]  ;;  %v122_v28 = vld [vmem:[%s407_s5 + $0x30] sm:$0xff] }
  0x10   :  { %99 = vmatpush.msra.mxu1 %v86_v7  ;;  %v121_v29 = vld [vmem:[%s407_s5 + $0x28] sm:$0xff]  ;;  %v120_v30 = vld [vmem:[%s407_s5 + $0x20] sm:$0xff]  ;;  %v119_v31 = vld [vmem:[%s407_s5 + $0x18] sm:$0xff] }
  0x11   :  { %138 = vmatpush.msra.mxu2 %v129_v21  ;;  %v187_v32 = vld [vmem:[%s404_s2] ss:$0 sm:$0xff]  ;;  %v118_v36 = vld [vmem:[%s407_s5 + $0x10] sm:$0xff]  ;;  %v117_v37 = vld [vmem:[%s407_s5 + $0x8] sm:$0xff] }
  0x12   :  { %100 = vmatpush.msra.mxu1 %v85_v8  ;;  %v116_v38 = vld [vmem:[%s407_s5] sm:$0xff]  ;;  %s247_s5 = smov [#allocation5]  }
  0x13   :  { %139 = vmatpush.msra.mxu2 %v128_v22  ;;  %v188_v39 = vld [vmem:[%s406_s4] ss:$0 sm:$0xff]  ;;  %s170_s25 = sshll.u32 %s247_s5, 4  ;;  %s171_s25 = int_to_ptr.vmem [resolvable:$true] %s170_s25 }
  0x14   :  { %101 = vmatpush.msra.mxu1 %v84_v9  ;;  %v189_v45 = vld [vmem:[%s408_s6] ss:$0 sm:$0xff] }
  0x15   :  { %140 = vmatpush.msra.mxu2 %v127_v23 }
  0x16   :  { %102 = vmatpush.msra.mxu1 %v83_v10 }
  0x17   :  { %141 = vmatpush.msra.mxu2 %v126_v24 }
  0x18   :  { %103 = vmatpush.msra.mxu1 %v82_v11 }
  0x19   :  { %142 = vmatpush.msra.mxu2 %v125_v25 }
  0x1a   :  { %104 = vmatpush.msra.mxu1 %v81_v12 }
  0x1b   :  { %143 = vmatpush.msra.mxu2 %v124_v26 }
  0x1c   :  { %105 = vmatpush.msra.mxu1 %v80_v13 }
  0x1d   :  { %144 = vmatpush.msra.mxu2 %v123_v27 }
  0x1e   :  { %106 = vmatpush.msra.mxu1 %v79_v14 }
  0x1f   :  { %145 = vmatpush.msra.mxu2 %v122_v28 }
  0x20   :  { %107 = vmatpush.msra.mxu1 %v78_v15 }
  0x21   :  { %146 = vmatpush.msra.mxu2 %v121_v29 }
  0x22   :  { %108 = vmatpush.msra.mxu1 %v77_v16 }
  0x23   :  { %147 = vmatpush.msra.mxu2 %v120_v30 }
  0x24   :  { %109 = vmatpush.msra.mxu1 %v76_v17 }
  0x25   :  { %148 = vmatpush.msra.mxu2 %v119_v31 }
  0x26   :  { %110 = vmatpush.msra.mxu1 %v75_v18 }
  0x27   :  { %149 = vmatpush.msra.mxu2 %v118_v36 }
  0x29   :  { %150 = vmatpush.msra.mxu2 %v117_v37 }
  0x2b   :  { %151 = vmatpush.msra.mxu2 %v116_v38 }
  0x87   :  { %v71_v33 = vpop.f32.mrf.mxu0 }
  0x88   :  { %v72_v34 = vadd.f32 %v187_v32, %v71_v33 }
  0x8a   :  { %v74_v35 = vmax.f32 %v72_v34, 0.0 }
  0x8c   :  { %111 = vmatmul.f32.vlgmr.msra.gmra.mxu1 %v74_v35 }
 0x109   :  { %v112_v40 = vpop.f32.mrf.mxu1 }
 0x10a   :  { %v113_v41 = vadd.f32 %v188_v39, %v112_v40 }
 0x10c   :  { %v115_v42 = vmax.f32 %v113_v41, 0.0 }
 0x10e   :  { %152 = vmatmul.f32.vlgmr.msra.gmra.mxu2 %v115_v42 }
 0x191   :  { %v153_v46 = vpop.f32.mrf.mxu2 }
 0x192   :  { %v154_v47 = vadd.f32 %v189_v45, %v153_v46 }
 0x194   :  { %v159_v48 = vsel %vm158_vm1, %v154_v47, 0.0 }
 0x195   :  { %v160_v49 = vmul.f32 1.442695, %v159_v48 }
 0x197   :  { %190 = vpow2.f32 %v160_v49 }
 0x19d   :  { %v191_v50 = vpop.eup %190 }
 0x19e   :  { %v162_v51 = vsel %vm158_vm1, %v191_v50, %v154_v47 }
 0x19f   :  { %164 = vst.msk [vmem:[#allocation5] sm:$0xff] %vm163_vm2, %v162_v51 }
 0x1a0   :  { %175 = dma.vmem_to_hbm [thread:$0]  %s171_s25, 128, %s173_s27, [#allocation4]  }
 0x1a1   :  { %242 = dma.done.wait [#allocation4], 128  }
 0x1a2   :  { %243 = vsyncadd [#allocation4], 4294967168 }
 0x1a3   :  { %180 = vsyncpa [#allocation3], 1 }
 0x1a4   :  { %181 = vsyncpa [#allocation4], 1 }

</bundles_post_ra>
